<compile_context>
chip_gen: v5e
topology: v5e:2x2
jax: 0.10.0
libtpu: 0.0.40
codegen_flags: <defaults>
</compile_context>

<pallas_src>
import jax
import jax.numpy as jnp
from jax.experimental import pallas as pl
from jax.experimental.pallas import tpu as pltpu

_BLOCK_ELEMS = 256 * 1024   # 1 MiB of f32 per pipeline block.
_LANE = 128


def _relu_kernel(x_ref, o_ref):
    # Single VPU vmax per vreg; scalar 0.0 avoids materializing a zero tile.
    o_ref[...] = jnp.maximum(x_ref[...], 0.0)


def _sublane_rows(dtype) -> int:
    # f32 -> 8 rows, bf16/f16 -> 16, int8/fp8 -> 32: keeps sublane packing dense.
    itemsize = jnp.dtype(dtype).itemsize
    return 8 * max(1, 4 // itemsize)


def _relu_single_block(flat: jax.Array) -> jax.Array:
    """One full-array block; `flat` is 1-D and small enough to live in VMEM."""
    total = flat.shape[0]
    rows = _sublane_rows(flat.dtype)
    pad = (-total) % rows
    padded = jnp.pad(flat, (0, pad)) if pad else flat
    cols = (total + pad) // rows
    x2d = padded.reshape(rows, cols)
    out2d = pl.pallas_call(
        _relu_kernel,
        out_shape=jax.ShapeDtypeStruct((rows, cols), flat.dtype),
        grid=(),
        in_specs=[pl.BlockSpec((rows, cols), lambda: (0, 0))],
        out_specs=pl.BlockSpec((rows, cols), lambda: (0, 0)),
        input_output_aliases={0: 0},
    )(x2d)
    out = out2d.reshape(rows * cols)
    return out[:total] if pad else out


def _relu_tiled(flat: jax.Array, cols: int) -> jax.Array:
    """Row-block tiled path; `flat.size` must be a multiple of `cols`."""
    total = flat.shape[0]
    rows = total // cols
    row_block = _BLOCK_ELEMS // cols               # multiple of 8 for cols<=32K
    row_block = min(row_block, max(8, (rows // 8) * 8))
    x2d = flat.reshape(rows, cols)
    out2d = pl.pallas_call(
        _relu_kernel,
        out_shape=jax.ShapeDtypeStruct((rows, cols), flat.dtype),
        grid=(pl.cdiv(rows, row_block),),          # ragged last block is masked
        in_specs=[pl.BlockSpec((row_block, cols), lambda i: (i, 0))],
        out_specs=pl.BlockSpec((row_block, cols), lambda i: (i, 0)),
        input_output_aliases={0: 0},
        compiler_params=pltpu.CompilerParams(
            dimension_semantics=("parallel",)),
    )(x2d)
    return out2d.reshape(total)


def relu_pallas(x: jax.Array) -> jax.Array:
    """Elementwise ReLU matching torch.nn.ReLU(inplace=True) forward semantics."""
    orig_shape = x.shape
    total = x.size
    flat = x.reshape(total)

    if total <= _BLOCK_ELEMS:
        # This module's tensor (1*1088*7*7 = 53312 elems, 213 KB) lands here:
        # a single lane/sublane-dense (8, 6664) block.
        return _relu_single_block(flat).reshape(orig_shape)

    # Large-activation path: lane-dense (rows, cols) view with cols a
    # 128-multiple divisor of the size; no pad/slice HBM round trips.
    for cols in (1024, 512, 256, _LANE):
        if total % cols == 0:
            return _relu_tiled(flat, cols).reshape(orig_shape)

    # Rare ragged case (size not a multiple of 128): tiled kernel on the
    # aligned bulk, single-block kernel on the tiny (<128 elem) tail.
    bulk = (total // _LANE) * _LANE
    head = _relu_tiled(flat[:bulk], _LANE)
    tail = _relu_single_block(flat[bulk:])
    return jnp.concatenate([head, tail]).reshape(orig_shape)


if __name__ == "__main__":
    key = jax.random.PRNGKey(0)
    # Shape from the module's forward: [1, 1088, 7, 7] (NCHW).
    shape = (1, 1088, 7, 7)
    x525 = jax.random.normal(key, shape, dtype=jnp.float32)

    # Compute the plain-JAX reference first so x525 is free to be donated
    # below (mirrors the in-place semantics of the PyTorch module).
    ref = jnp.maximum(x525, 0.0)
    jax.block_until_ready(ref)

    relu = jax.jit(relu_pallas, donate_argnums=(0,))
    x526 = relu(x525)
    jax.block_until_ready(x526)

    assert x526.shape == shape
    assert x526.dtype == jnp.float32
    assert bool(jnp.all(x526 == ref))

    print("KERNEL_OK")
</pallas_src>

<mosaic_0001>
module attributes {stable_mosaic.version = 11 : i64} {
  func.func @_relu_kernel(%arg0: memref<8x6664xf32, #tpu.memory_space<vmem>>, %arg1: memref<8x6664xf32, #tpu.memory_space<vmem>>) attributes {dimension_semantics = [], scalar_prefetch = 0 : i64, scratch_operands = 0 : i64, tpu.core_type = #tpu.core_type<tc>} {
    %c0 = arith.constant 0 : index
    %c0_0 = arith.constant 0 : index
    %0 = vector.load %arg0[%c0, %c0_0] : memref<8x6664xf32, #tpu.memory_space<vmem>>, vector<8x6664xf32>
    %cst = arith.constant 0.000000e+00 : f32
    %1 = vector.broadcast %cst : f32 to vector<8x6664xf32>
    %2 = arith.maximumf %0, %1 : vector<8x6664xf32>
    %c0_1 = arith.constant 0 : index
    %c0_2 = arith.constant 0 : index
    %3 = vector.load %arg1[%c0_1, %c0_2] : memref<8x6664xf32, #tpu.memory_space<vmem>>, vector<8x6664xf32>
    tpu.vector_store %arg1[%c0_1, %c0_2], %2 {strides = array<i32>} : memref<8x6664xf32, #tpu.memory_space<vmem>>, vector<8x6664xf32>,
    return
  }
}

</mosaic_0001>

<bundles_post_ra>
// kernel: relu_pallas.1
= control target key start
LH: loop header
LB: loop body
LE: loop exit
PB: predicated region body
PF: predicated region fallthrough
CT: control target
= control target key end

     0   :  { %vm166_vm0 = vcmask 64512   ;;  %s500_s0 = inlined_call_operand.vmem [shape: f32[8,6664], index: 0, kind: input, shape index: {}, may-alias: {0,1}]   ;;  %s501_s1 = inlined_call_operand.vmem [shape: f32[8,6664], index: 1, kind: output, shape index: {}, may-alias: {0,1}]  }
   0x1   :  { %v8_v0 = vld [vmem:[%s500_s0] sm:$0xff]  ;;  %v9_v1 = vld [vmem:[%s500_s0 + $0x8] sm:$0xff]  ;;  %v10_v2 = vld [vmem:[%s500_s0 + $0x10] sm:$0xff] }
   0x2   :  { %v61_v3 = vmax.f32 %v8_v0, 0.0  ;;  %v62_v4 = vmax.f32 %v9_v1, 0.0  ;;  %v63_v5 = vmax.f32 %v10_v2, 0.0  ;;  %v11_v6 = vld [vmem:[%s500_s0 + $0x18] sm:$0xff]  ;;  %v12_v7 = vld [vmem:[%s500_s0 + $0x20] sm:$0xff]  ;;  %v13_v8 = vld [vmem:[%s500_s0 + $0x28] sm:$0xff] }
   0x3   :  { %v64_v9 = vmax.f32 %v11_v6, 0.0  ;;  %v14_v10 = vld [vmem:[%s500_s0 + $0x30] sm:$0xff]  ;;  %v65_v11 = vmax.f32 %v12_v7, 0.0  ;;  %v66_v13 = vmax.f32 %v13_v8, 0.0 }
   0x4   :  { %114 = vst [vmem:[%s501_s1] sm:$0xff] %v61_v3  ;;  %v67_v15 = vmax.f32 %v14_v10, 0.0 }
   0xb   :  { %v15_v12 = vld [vmem:[%s500_s0 + $0x38] sm:$0xff] }
   0xc   :  { %115 = vst [vmem:[%s501_s1 + $0x8] sm:$0xff] %v62_v4  ;;  %v68_v17 = vmax.f32 %v15_v12, 0.0 }
  0x13   :  { %v16_v14 = vld [vmem:[%s500_s0 + $0x40] sm:$0xff] }
  0x14   :  { %116 = vst [vmem:[%s501_s1 + $0x10] sm:$0xff] %v63_v5  ;;  %v69_v19 = vmax.f32 %v16_v14, 0.0 }
  0x1b   :  { %v17_v16 = vld [vmem:[%s500_s0 + $0x48] sm:$0xff] }
  0x1c   :  { %117 = vst [vmem:[%s501_s1 + $0x18] sm:$0xff] %v64_v9  ;;  %v70_v21 = vmax.f32 %v17_v16, 0.0 }
  0x23   :  { %v18_v18 = vld [vmem:[%s500_s0 + $0x50] sm:$0xff] }
  0x24   :  { %118 = vst [vmem:[%s501_s1 + $0x20] sm:$0xff] %v65_v11  ;;  %v71_v23 = vmax.f32 %v18_v18, 0.0 }
  0x2b   :  { %v19_v20 = vld [vmem:[%s500_s0 + $0x58] sm:$0xff] }
  0x2c   :  { %119 = vst [vmem:[%s501_s1 + $0x28] sm:$0xff] %v66_v13  ;;  %v72_v25 = vmax.f32 %v19_v20, 0.0 }
  0x33   :  { %v20_v22 = vld [vmem:[%s500_s0 + $0x60] sm:$0xff] }
  0x34   :  { %120 = vst [vmem:[%s501_s1 + $0x30] sm:$0xff] %v67_v15  ;;  %v73_v27 = vmax.f32 %v20_v22, 0.0 }
  0x3b   :  { %v21_v24 = vld [vmem:[%s500_s0 + $0x68] sm:$0xff] }
  0x3c   :  { %121 = vst [vmem:[%s501_s1 + $0x38] sm:$0xff] %v68_v17  ;;  %v74_v29 = vmax.f32 %v21_v24, 0.0 }
  0x43   :  { %v22_v26 = vld [vmem:[%s500_s0 + $0x70] sm:$0xff] }
  0x44   :  { %122 = vst [vmem:[%s501_s1 + $0x40] sm:$0xff] %v69_v19  ;;  %v75_v31 = vmax.f32 %v22_v26, 0.0 }
  0x4b   :  { %v23_v28 = vld [vmem:[%s500_s0 + $0x78] sm:$0xff] }
  0x4c   :  { %123 = vst [vmem:[%s501_s1 + $0x48] sm:$0xff] %v70_v21  ;;  %v76_v33 = vmax.f32 %v23_v28, 0.0 }
  0x53   :  { %v24_v30 = vld [vmem:[%s500_s0 + $0x80] sm:$0xff] }
  0x54   :  { %124 = vst [vmem:[%s501_s1 + $0x50] sm:$0xff] %v71_v23  ;;  %v77_v35 = vmax.f32 %v24_v30, 0.0 }
  0x5b   :  { %v25_v32 = vld [vmem:[%s500_s0 + $0x88] sm:$0xff] }
  0x5c   :  { %125 = vst [vmem:[%s501_s1 + $0x58] sm:$0xff] %v72_v25  ;;  %v78_v37 = vmax.f32 %v25_v32, 0.0 }
  0x63   :  { %v26_v34 = vld [vmem:[%s500_s0 + $0x90] sm:$0xff] }
  0x64   :  { %126 = vst [vmem:[%s501_s1 + $0x60] sm:$0xff] %v73_v27  ;;  %v79_v39 = vmax.f32 %v26_v34, 0.0 }
  0x6b   :  { %v27_v36 = vld [vmem:[%s500_s0 + $0x98] sm:$0xff] }
  0x6c   :  { %127 = vst [vmem:[%s501_s1 + $0x68] sm:$0xff] %v74_v29  ;;  %v80_v41 = vmax.f32 %v27_v36, 0.0 }
  0x73   :  { %v28_v38 = vld [vmem:[%s500_s0 + $0xa0] sm:$0xff] }
  0x74   :  { %128 = vst [vmem:[%s501_s1 + $0x70] sm:$0xff] %v75_v31  ;;  %v81_v43 = vmax.f32 %v28_v38, 0.0 }
  0x7b   :  { %v29_v40 = vld [vmem:[%s500_s0 + $0xa8] sm:$0xff] }
  0x7c   :  { %129 = vst [vmem:[%s501_s1 + $0x78] sm:$0xff] %v76_v33  ;;  %v82_v45 = vmax.f32 %v29_v40, 0.0 }
  0x83   :  { %v30_v42 = vld [vmem:[%s500_s0 + $0xb0] sm:$0xff] }
  0x84   :  { %130 = vst [vmem:[%s501_s1 + $0x80] sm:$0xff] %v77_v35  ;;  %v83_v47 = vmax.f32 %v30_v42, 0.0 }
  0x8b   :  { %v31_v44 = vld [vmem:[%s500_s0 + $0xb8] sm:$0xff] }
  0x8c   :  { %131 = vst [vmem:[%s501_s1 + $0x88] sm:$0xff] %v78_v37  ;;  %v84_v49 = vmax.f32 %v31_v44, 0.0 }
  0x93   :  { %v32_v46 = vld [vmem:[%s500_s0 + $0xc0] sm:$0xff] }
  0x94   :  { %132 = vst [vmem:[%s501_s1 + $0x90] sm:$0xff] %v79_v39  ;;  %v85_v51 = vmax.f32 %v32_v46, 0.0 }
  0x9b   :  { %v33_v48 = vld [vmem:[%s500_s0 + $0xc8] sm:$0xff] }
  0x9c   :  { %133 = vst [vmem:[%s501_s1 + $0x98] sm:$0xff] %v80_v41  ;;  %v86_v53 = vmax.f32 %v33_v48, 0.0 }
  0xa3   :  { %v34_v50 = vld [vmem:[%s500_s0 + $0xd0] sm:$0xff] }
  0xa4   :  { %134 = vst [vmem:[%s501_s1 + $0xa0] sm:$0xff] %v81_v43  ;;  %v87_v55 = vmax.f32 %v34_v50, 0.0 }
  0xab   :  { %v35_v52 = vld [vmem:[%s500_s0 + $0xd8] sm:$0xff] }
  0xac   :  { %135 = vst [vmem:[%s501_s1 + $0xa8] sm:$0xff] %v82_v45  ;;  %v88_v57 = vmax.f32 %v35_v52, 0.0 }
  0xb3   :  { %v36_v54 = vld [vmem:[%s500_s0 + $0xe0] sm:$0xff] }
  0xb4   :  { %136 = vst [vmem:[%s501_s1 + $0xb0] sm:$0xff] %v83_v47  ;;  %v89_v59 = vmax.f32 %v36_v54, 0.0 }
  0xbb   :  { %v37_v56 = vld [vmem:[%s500_s0 + $0xe8] sm:$0xff] }
  0xbc   :  { %137 = vst [vmem:[%s501_s1 + $0xb8] sm:$0xff] %v84_v49  ;;  %v90_v61 = vmax.f32 %v37_v56, 0.0 }
  0xc3   :  { %v38_v58 = vld [vmem:[%s500_s0 + $0xf0] sm:$0xff] }
  0xc4   :  { %138 = vst [vmem:[%s501_s1 + $0xc0] sm:$0xff] %v85_v51  ;;  %v91_v63 = vmax.f32 %v38_v58, 0.0 }
  0xcb   :  { %v39_v60 = vld [vmem:[%s500_s0 + $0xf8] sm:$0xff] }
  0xcc   :  { %139 = vst [vmem:[%s501_s1 + $0xc8] sm:$0xff] %v86_v53  ;;  %v92_v1 = vmax.f32 %v39_v60, 0.0 }
  0xd3   :  { %v40_v62 = vld [vmem:[%s500_s0 + $0x100] sm:$0xff] }
  0xd4   :  { %140 = vst [vmem:[%s501_s1 + $0xd0] sm:$0xff] %v87_v55  ;;  %v93_v3 = vmax.f32 %v40_v62, 0.0 }
  0xdb   :  { %v41_v0 = vld [vmem:[%s500_s0 + $0x108] sm:$0xff] }
  0xdc   :  { %141 = vst [vmem:[%s501_s1 + $0xd8] sm:$0xff] %v88_v57  ;;  %v94_v5 = vmax.f32 %v41_v0, 0.0 }
  0xe3   :  { %v42_v2 = vld [vmem:[%s500_s0 + $0x110] sm:$0xff] }
  0xe4   :  { %142 = vst [vmem:[%s501_s1 + $0xe0] sm:$0xff] %v89_v59  ;;  %v95_v7 = vmax.f32 %v42_v2, 0.0 }
  0xeb   :  { %v43_v4 = vld [vmem:[%s500_s0 + $0x118] sm:$0xff] }
  0xec   :  { %143 = vst [vmem:[%s501_s1 + $0xe8] sm:$0xff] %v90_v61  ;;  %v96_v9 = vmax.f32 %v43_v4, 0.0 }
  0xf3   :  { %v44_v6 = vld [vmem:[%s500_s0 + $0x120] sm:$0xff] }
  0xf4   :  { %144 = vst [vmem:[%s501_s1 + $0xf0] sm:$0xff] %v91_v63  ;;  %v97_v11 = vmax.f32 %v44_v6, 0.0 }
  0xfb   :  { %v45_v8 = vld [vmem:[%s500_s0 + $0x128] sm:$0xff] }
  0xfc   :  { %145 = vst [vmem:[%s501_s1 + $0xf8] sm:$0xff] %v92_v1  ;;  %v98_v13 = vmax.f32 %v45_v8, 0.0 }
 0x103   :  { %v46_v10 = vld [vmem:[%s500_s0 + $0x130] sm:$0xff] }
 0x104   :  { %146 = vst [vmem:[%s501_s1 + $0x100] sm:$0xff] %v93_v3  ;;  %v99_v15 = vmax.f32 %v46_v10, 0.0 }
 0x10b   :  { %v47_v12 = vld [vmem:[%s500_s0 + $0x138] sm:$0xff] }
 0x10c   :  { %147 = vst [vmem:[%s501_s1 + $0x108] sm:$0xff] %v94_v5  ;;  %v100_v17 = vmax.f32 %v47_v12, 0.0 }
 0x113   :  { %v48_v14 = vld [vmem:[%s500_s0 + $0x140] sm:$0xff] }
 0x114   :  { %148 = vst [vmem:[%s501_s1 + $0x110] sm:$0xff] %v95_v7  ;;  %v101_v19 = vmax.f32 %v48_v14, 0.0 }
 0x11b   :  { %v49_v16 = vld [vmem:[%s500_s0 + $0x148] sm:$0xff] }
 0x11c   :  { %149 = vst [vmem:[%s501_s1 + $0x118] sm:$0xff] %v96_v9  ;;  %v102_v21 = vmax.f32 %v49_v16, 0.0 }
 0x123   :  { %v50_v18 = vld [vmem:[%s500_s0 + $0x150] sm:$0xff] }
 0x124   :  { %150 = vst [vmem:[%s501_s1 + $0x120] sm:$0xff] %v97_v11  ;;  %v103_v23 = vmax.f32 %v50_v18, 0.0 }
 0x12b   :  { %v51_v20 = vld [vmem:[%s500_s0 + $0x158] sm:$0xff] }
 0x12c   :  { %151 = vst [vmem:[%s501_s1 + $0x128] sm:$0xff] %v98_v13  ;;  %v104_v25 = vmax.f32 %v51_v20, 0.0 }
 0x133   :  { %v52_v22 = vld [vmem:[%s500_s0 + $0x160] sm:$0xff] }
 0x134   :  { %152 = vst [vmem:[%s501_s1 + $0x130] sm:$0xff] %v99_v15  ;;  %v105_v27 = vmax.f32 %v52_v22, 0.0 }
 0x13b   :  { %v53_v24 = vld [vmem:[%s500_s0 + $0x168] sm:$0xff] }
 0x13c   :  { %153 = vst [vmem:[%s501_s1 + $0x138] sm:$0xff] %v100_v17  ;;  %v106_v29 = vmax.f32 %v53_v24, 0.0 }
 0x143   :  { %v54_v26 = vld [vmem:[%s500_s0 + $0x170] sm:$0xff] }
 0x144   :  { %154 = vst [vmem:[%s501_s1 + $0x140] sm:$0xff] %v101_v19  ;;  %v107_v31 = vmax.f32 %v54_v26, 0.0 }
 0x14b   :  { %v55_v28 = vld [vmem:[%s500_s0 + $0x178] sm:$0xff] }
 0x14c   :  { %155 = vst [vmem:[%s501_s1 + $0x148] sm:$0xff] %v102_v21  ;;  %v108_v33 = vmax.f32 %v55_v28, 0.0 }
 0x153   :  { %v56_v30 = vld [vmem:[%s500_s0 + $0x180] sm:$0xff] }
 0x154   :  { %156 = vst [vmem:[%s501_s1 + $0x150] sm:$0xff] %v103_v23  ;;  %v109_v35 = vmax.f32 %v56_v30, 0.0 }
 0x15b   :  { %v57_v32 = vld [vmem:[%s500_s0 + $0x188] sm:$0xff] }
 0x15c   :  { %157 = vst [vmem:[%s501_s1 + $0x158] sm:$0xff] %v104_v25  ;;  %v110_v37 = vmax.f32 %v57_v32, 0.0 }
 0x163   :  { %v58_v34 = vld [vmem:[%s500_s0 + $0x190] sm:$0xff] }
 0x164   :  { %158 = vst [vmem:[%s501_s1 + $0x160] sm:$0xff] %v105_v27  ;;  %v111_v39 = vmax.f32 %v58_v34, 0.0 }
 0x16b   :  { %v59_v36 = vld [vmem:[%s500_s0 + $0x198] sm:$0xff] }
 0x16c   :  { %159 = vst [vmem:[%s501_s1 + $0x168] sm:$0xff] %v106_v29  ;;  %v112_v40 = vmax.f32 %v59_v36, 0.0 }
 0x173   :  { %v60_v38 = vld [vmem:[%s500_s0 + $0x1a0] sm:$0xff] }
 0x174   :  { %160 = vst [vmem:[%s501_s1 + $0x170] sm:$0xff] %v107_v31  ;;  %v113_v41 = vmax.f32 %v60_v38, 0.0 }
 0x175   :  { %161 = vst [vmem:[%s501_s1 + $0x178] sm:$0xff] %v108_v33 }
 0x176   :  { %162 = vst [vmem:[%s501_s1 + $0x180] sm:$0xff] %v109_v35 }
 0x177   :  { %163 = vst [vmem:[%s501_s1 + $0x188] sm:$0xff] %v110_v37 }
 0x178   :  { %164 = vst [vmem:[%s501_s1 + $0x190] sm:$0xff] %v111_v39 }
 0x179   :  { %165 = vst [vmem:[%s501_s1 + $0x198] sm:$0xff] %v112_v40 }
 0x17a   :  { %167 = vst.msk [vmem:[%s501_s1 + $0x1a0] sm:$0xff] %vm166_vm0, %v113_v41 }

</bundles_post_ra>
